<compile_context>
chip_gen: v7x
topology: tpu7x:2x2x1
jax: 0.10.0
libtpu: 0.0.40
codegen_flags: <defaults>
</compile_context>

<pallas_src>
import math

import jax
import jax.numpy as jnp
from jax import lax
from jax.experimental import pallas as pl
from jax.experimental.pallas import tpu as pltpu

# ---- model hyper-parameters (small, consistent with the module) ----
N_EMBD = 32
N_HEAD = 4
HEAD_DIM = N_EMBD // N_HEAD

MASK_VALUE = -1e30                 # large finite negative (safer than -inf)
MXU_DTYPE = jnp.bfloat16           # MXU operand dtype; accumulation is f32


def attention_kernel(x_ref, wqkv_ref, bqkv_ref, wp_ref, bp_ref,
                     y_ref, attn_ref, y_scr):
    BB, T, C = x_ref.shape
    H, hd = N_HEAD, HEAD_DIM
    scale = 1.0 / math.sqrt(hd)

    # ---- fused QKV projection over all BB*T rows (single MXU matmul) ----
    x2d = x_ref[...].reshape(BB * T, C).astype(MXU_DTYPE)
    qkv = jnp.dot(x2d, wqkv_ref[...], preferred_element_type=jnp.float32)
    qkv = qkv + bqkv_ref[...]                                   # (BB*T, 3C) f32

    # scale folded into q: O(rows*C) multiplies instead of O(rows*T) on scores
    q = (qkv[:, 0 * C:1 * C] * scale).astype(MXU_DTYPE)
    k = qkv[:, 1 * C:2 * C].astype(MXU_DTYPE)
    v = qkv[:, 2 * C:3 * C].astype(MXU_DTYPE)

    # causal (lower-triangular) mask, shared by every (batch, head) pair
    row = lax.broadcasted_iota(jnp.int32, (T, T), 0)
    col = lax.broadcasted_iota(jnp.int32, (T, T), 1)
    causal = col <= row

    # ---- per (batch-in-block, head) attention (static unroll) ----
    for b in range(BB):
        rows = slice(b * T, (b + 1) * T)
        for h in range(H):
            cols = slice(h * hd, (h + 1) * hd)
            qh = q[rows, cols]                                  # (T, hd)
            kh = k[rows, cols]
            vh = v[rows, cols]

            # q @ k^T without an explicit transpose (contract last dims)
            s = lax.dot_general(
                qh, kh,
                dimension_numbers=(((1,), (1,)), ((), ())),
                preferred_element_type=jnp.float32)             # (T, T) f32
            s = jnp.where(causal, s, MASK_VALUE)
            s = s - jnp.max(s, axis=-1, keepdims=True)
            e = jnp.exp(s)
            denom = jnp.sum(e, axis=-1, keepdims=True)
            p = e * pl.reciprocal(denom, approx=True)           # softmax probs

            attn_ref[b, h] = p                                  # attn_save
            # TODO(synk): attn_drop / resid_drop are identity (eval mode)

            yh = jnp.dot(p.astype(MXU_DTYPE), vh,
                         preferred_element_type=jnp.float32)    # (T, hd)
            y_scr[rows, cols] = yh          # head columns written in place

    # ---- output projection over all BB*T rows (single MXU matmul) ----
    y2d = y_scr[...].astype(MXU_DTYPE)
    out = jnp.dot(y2d, wp_ref[...], preferred_element_type=jnp.float32)
    out = out + bp_ref[...]
    y_ref[...] = out.reshape(BB, T, C)


def attention_forward(x, params, *, batch_block=1):
    """Causal multi-head self-attention.

    x: (B, T, C) float32.
    params: [wqkv (C,3C), bqkv (1,3C), wproj (C,C), bproj (1,C)]  (float32).
    Returns (y (B,T,C) f32, attn (B,H,T,T) f32).
    """
    B, T, C = x.shape
    assert C == N_EMBD and C % N_HEAD == 0
    assert B % batch_block == 0
    BB = batch_block
    grid = (B // BB,)

    wqkv, bqkv, wp, bp = params
    # Cast matmul weights once outside the kernel; biases / element-wise math
    # stay f32 (v5e guidance: no bf16 VALU/EUP).
    wqkv_m = wqkv.astype(MXU_DTYPE)
    wp_m = wp.astype(MXU_DTYPE)

    def full_spec(a):
        n = a.ndim
        return pl.BlockSpec(a.shape, lambda i, n=n: (0,) * n)

    in_specs = [
        pl.BlockSpec((BB, T, C), lambda i: (i, 0, 0)),
        full_spec(wqkv_m), full_spec(bqkv), full_spec(wp_m), full_spec(bp),
    ]
    out_specs = (
        pl.BlockSpec((BB, T, C), lambda i: (i, 0, 0)),
        pl.BlockSpec((BB, N_HEAD, T, T), lambda i: (i, 0, 0, 0)),
    )
    out_shape = (
        jax.ShapeDtypeStruct((B, T, C), jnp.float32),
        jax.ShapeDtypeStruct((B, N_HEAD, T, T), jnp.float32),
    )

    return pl.pallas_call(
        attention_kernel,
        grid=grid,
        in_specs=in_specs,
        out_specs=out_specs,
        out_shape=out_shape,
        scratch_shapes=[pltpu.VMEM((BB * T, C), jnp.float32)],
        compiler_params=pltpu.CompilerParams(
            dimension_semantics=("parallel",)),
    )(x, wqkv_m, bqkv, wp_m, bp)


def init_params(key, n_embd=N_EMBD):
    """Deterministic init. Weights are stored already transposed so the kernel
    computes y = x @ W + b (== PyTorch's x @ W_lin.T + b).  q/k/v are fused
    into one (C, 3C) weight and one (1, 3C) bias, ordered [q | k | v]."""
    s = 0.02
    kq, kk, kv, kp = jax.random.split(key, 4)

    def lin(k, din, dout):
        w = jax.random.normal(k, (din, dout), jnp.float32) * s
        b = jax.random.normal(jax.random.fold_in(k, 1), (1, dout), jnp.float32) * s
        return w, b

    wq, bq = lin(kq, n_embd, n_embd)
    wk, bk = lin(kk, n_embd, n_embd)
    wv, bv = lin(kv, n_embd, n_embd)
    wp, bp = lin(kp, n_embd, n_embd)

    wqkv = jnp.concatenate([wq, wk, wv], axis=1)   # (C, 3C)
    bqkv = jnp.concatenate([bq, bk, bv], axis=1)   # (1, 3C)
    return [wqkv, bqkv, wp, bp]


if __name__ == "__main__":
    key = jax.random.PRNGKey(0)
    k_x, k_p = jax.random.split(key)

    B, T, C = 2, 8, N_EMBD
    x = jax.random.normal(k_x, (B, T, C), jnp.float32)
    params = init_params(k_p)

    y, attn = jax.jit(attention_forward)(x, params)
    jax.block_until_ready((y, attn))

    assert y.shape == (B, T, C)
    assert attn.shape == (B, N_HEAD, T, T)
    print("KERNEL_OK")
</pallas_src>

<mosaic_0001>
module attributes {stable_mosaic.version = 11 : i64} {
  func.func @attention_kernel(%arg0: i32, %arg1: memref<1x8x32xf32, #tpu.memory_space<vmem>>, %arg2: memref<32x96xbf16, #tpu.memory_space<vmem>>, %arg3: memref<1x96xf32, #tpu.memory_space<vmem>>, %arg4: memref<32x32xbf16, #tpu.memory_space<vmem>>, %arg5: memref<1x32xf32, #tpu.memory_space<vmem>>, %arg6: memref<1x8x32xf32, #tpu.memory_space<vmem>>, %arg7: memref<1x4x8x8xf32, #tpu.memory_space<vmem>>, %arg8: memref<8x32xf32, #tpu.memory_space<vmem>>) attributes {dimension_semantics = [#tpu.dimension_semantics<parallel>], iteration_bounds = array<i64: 2>, scalar_prefetch = 0 : i64, scratch_operands = 1 : i64, tpu.core_type = #tpu.core_type<tc>, window_params = [{transform_indices = @transform_0, window_bounds = array<i64: 1, 8, 32>}, {pipeline_mode = #tpu.pipeline_mode<synchronous>, transform_indices = @transform_1, window_bounds = array<i64: 32, 96>}, {pipeline_mode = #tpu.pipeline_mode<synchronous>, transform_indices = @transform_2, window_bounds = array<i64: 1, 96>}, {pipeline_mode = #tpu.pipeline_mode<synchronous>, transform_indices = @transform_3, window_bounds = array<i64: 32, 32>}, {pipeline_mode = #tpu.pipeline_mode<synchronous>, transform_indices = @transform_4, window_bounds = array<i64: 1, 32>}, {transform_indices = @transform_5, window_bounds = array<i64: 1, 8, 32>}, {transform_indices = @transform_6, window_bounds = array<i64: 1, 4, 8, 8>}]} {
    %c0 = arith.constant 0 : index
    %c0_0 = arith.constant 0 : index
    %c0_1 = arith.constant 0 : index
    %0 = vector.load %arg1[%c0, %c0_0, %c0_1] : memref<1x8x32xf32, #tpu.memory_space<vmem>>, vector<1x8x32xf32>
    %1 = vector.shape_cast %0 : vector<1x8x32xf32> to vector<8x32xf32>
    %2 = arith.truncf %1 : vector<8x32xf32> to vector<8x32xbf16>
    %c0_2 = arith.constant 0 : index
    %c0_3 = arith.constant 0 : index
    %3 = vector.load %arg2[%c0_2, %c0_3] : memref<32x96xbf16, #tpu.memory_space<vmem>>, vector<32x96xbf16>
    %cst = arith.constant dense<0.000000e+00> : vector<8x96xf32>
    %4 = tpu.matmul %2, %3, %cst {dimension_numbers = #tpu.dot_dimension_numbers<[1], [0], [0], [1], [0, 0, 1, 1], [], []>} : vector<8x32xbf16>, vector<32x96xbf16>, vector<8x96xf32> -> vector<8x96xf32>
    %c0_4 = arith.constant 0 : index
    %c0_5 = arith.constant 0 : index
    %5 = vector.load %arg3[%c0_4, %c0_5] : memref<1x96xf32, #tpu.memory_space<vmem>>, vector<1x96xf32>
    %6 = vector.broadcast %5 : vector<1x96xf32> to vector<8x96xf32>
    %7 = arith.addf %4, %6 : vector<8x96xf32>
    %8 = vector.extract_strided_slice %7 {offsets = [0, 0], sizes = [8, 32], strides = [1, 1]} : vector<8x96xf32> to vector<8x32xf32>
    %cst_6 = arith.constant 0.353553385 : f32
    %9 = vector.broadcast %cst_6 : f32 to vector<8x32xf32>
    %10 = arith.mulf %8, %9 : vector<8x32xf32>
    %11 = arith.truncf %10 : vector<8x32xf32> to vector<8x32xbf16>
    %12 = vector.extract_strided_slice %7 {offsets = [0, 32], sizes = [8, 32], strides = [1, 1]} : vector<8x96xf32> to vector<8x32xf32>
    %13 = arith.truncf %12 : vector<8x32xf32> to vector<8x32xbf16>
    %14 = vector.extract_strided_slice %7 {offsets = [0, 64], sizes = [8, 32], strides = [1, 1]} : vector<8x96xf32> to vector<8x32xf32>
    %15 = arith.truncf %14 : vector<8x32xf32> to vector<8x32xbf16>
    %16 = tpu.iota {dimensions = array<i32: 0>} : vector<8x8xi32>
    %17 = tpu.iota {dimensions = array<i32: 1>} : vector<8x8xi32>
    %18 = arith.cmpi sle, %17, %16 : vector<8x8xi32>
    %19 = vector.extract_strided_slice %11 {offsets = [0, 0], sizes = [8, 8], strides = [1, 1]} : vector<8x32xbf16> to vector<8x8xbf16>
    %20 = vector.extract_strided_slice %13 {offsets = [0, 0], sizes = [8, 8], strides = [1, 1]} : vector<8x32xbf16> to vector<8x8xbf16>
    %21 = vector.extract_strided_slice %15 {offsets = [0, 0], sizes = [8, 8], strides = [1, 1]} : vector<8x32xbf16> to vector<8x8xbf16>
    %cst_7 = arith.constant dense<0.000000e+00> : vector<8x8xf32>
    %22 = tpu.matmul %19, %20, %cst_7 {dimension_numbers = #tpu.dot_dimension_numbers<[1], [1], [0], [0], [0, 0, 1, 0], [], []>} : vector<8x8xbf16>, vector<8x8xbf16>, vector<8x8xf32> -> vector<8x8xf32>
    %cst_8 = arith.constant -1.000000e+30 : f32
    %23 = vector.broadcast %cst_8 : f32 to vector<8x8xf32>
    %24 = arith.select %18, %22, %23 : vector<8x8xi1>, vector<8x8xf32>
    %cst_9 = arith.constant dense<0xFF800000> : vector<8xf32>
    %25 = vector.multi_reduction <maximumf>, %24, %cst_9 [1] : vector<8x8xf32> to vector<8xf32>
    %26 = vector.shape_cast %25 : vector<8xf32> to vector<8x1xf32>
    %27 = vector.broadcast %26 : vector<8x1xf32> to vector<8x8xf32>
    %28 = arith.subf %24, %27 : vector<8x8xf32>
    %29 = math.exp %28 : vector<8x8xf32>
    %cst_10 = arith.constant dense<0.000000e+00> : vector<8xf32>
    %30 = vector.multi_reduction <add>, %29, %cst_10 [1] : vector<8x8xf32> to vector<8xf32>
    %31 = vector.shape_cast %30 : vector<8xf32> to vector<8x1xf32>
    %32 = tpu.reciprocal %31 {approx = true} : vector<8x1xf32> -> vector<8x1xf32>
    %33 = vector.broadcast %32 : vector<8x1xf32> to vector<8x8xf32>
    %34 = arith.mulf %29, %33 : vector<8x8xf32>
    %c0_11 = arith.constant 0 : index
    %c0_12 = arith.constant 0 : index
    %c0_13 = arith.constant 0 : index
    %c0_14 = arith.constant 0 : index
    %35 = vector.load %arg7[%c0_11, %c0_12, %c0_13, %c0_14] : memref<1x4x8x8xf32, #tpu.memory_space<vmem>>, vector<1x1x8x8xf32>
    %36 = vector.shape_cast %35 : vector<1x1x8x8xf32> to vector<8x8xf32>
    %37 = vector.shape_cast %34 : vector<8x8xf32> to vector<1x1x8x8xf32>
    tpu.vector_store %arg7[%c0_11, %c0_12, %c0_13, %c0_14], %37 {strides = array<i32>} : memref<1x4x8x8xf32, #tpu.memory_space<vmem>>, vector<1x1x8x8xf32>,
    %38 = arith.truncf %34 : vector<8x8xf32> to vector<8x8xbf16>
    %cst_15 = arith.constant dense<0.000000e+00> : vector<8x8xf32>
    %39 = tpu.matmul %38, %21, %cst_15 {dimension_numbers = #tpu.dot_dimension_numbers<[1], [0], [0], [1], [0, 0, 1, 1], [], []>} : vector<8x8xbf16>, vector<8x8xbf16>, vector<8x8xf32> -> vector<8x8xf32>
    %c0_16 = arith.constant 0 : index
    %c0_17 = arith.constant 0 : index
    %40 = vector.load %arg8[%c0_16, %c0_17] : memref<8x32xf32, #tpu.memory_space<vmem>>, vector<8x8xf32>
    tpu.vector_store %arg8[%c0_16, %c0_17], %39 {strides = array<i32>} : memref<8x32xf32, #tpu.memory_space<vmem>>, vector<8x8xf32>,
    %41 = vector.extract_strided_slice %11 {offsets = [0, 8], sizes = [8, 8], strides = [1, 1]} : vector<8x32xbf16> to vector<8x8xbf16>
    %42 = vector.extract_strided_slice %13 {offsets = [0, 8], sizes = [8, 8], strides = [1, 1]} : vector<8x32xbf16> to vector<8x8xbf16>
    %43 = vector.extract_strided_slice %15 {offsets = [0, 8], sizes = [8, 8], strides = [1, 1]} : vector<8x32xbf16> to vector<8x8xbf16>
    %cst_18 = arith.constant dense<0.000000e+00> : vector<8x8xf32>
    %44 = tpu.matmul %41, %42, %cst_18 {dimension_numbers = #tpu.dot_dimension_numbers<[1], [1], [0], [0], [0, 0, 1, 0], [], []>} : vector<8x8xbf16>, vector<8x8xbf16>, vector<8x8xf32> -> vector<8x8xf32>
    %cst_19 = arith.constant -1.000000e+30 : f32
    %45 = vector.broadcast %cst_19 : f32 to vector<8x8xf32>
    %46 = arith.select %18, %44, %45 : vector<8x8xi1>, vector<8x8xf32>
    %cst_20 = arith.constant dense<0xFF800000> : vector<8xf32>
    %47 = vector.multi_reduction <maximumf>, %46, %cst_20 [1] : vector<8x8xf32> to vector<8xf32>
    %48 = vector.shape_cast %47 : vector<8xf32> to vector<8x1xf32>
    %49 = vector.broadcast %48 : vector<8x1xf32> to vector<8x8xf32>
    %50 = arith.subf %46, %49 : vector<8x8xf32>
    %51 = math.exp %50 : vector<8x8xf32>
    %cst_21 = arith.constant dense<0.000000e+00> : vector<8xf32>
    %52 = vector.multi_reduction <add>, %51, %cst_21 [1] : vector<8x8xf32> to vector<8xf32>
    %53 = vector.shape_cast %52 : vector<8xf32> to vector<8x1xf32>
    %54 = tpu.reciprocal %53 {approx = true} : vector<8x1xf32> -> vector<8x1xf32>
    %55 = vector.broadcast %54 : vector<8x1xf32> to vector<8x8xf32>
    %56 = arith.mulf %51, %55 : vector<8x8xf32>
    %c0_22 = arith.constant 0 : index
    %c1 = arith.constant 1 : index
    %c0_23 = arith.constant 0 : index
    %c0_24 = arith.constant 0 : index
    %57 = vector.load %arg7[%c0_22, %c1, %c0_23, %c0_24] : memref<1x4x8x8xf32, #tpu.memory_space<vmem>>, vector<1x1x8x8xf32>
    %58 = vector.shape_cast %57 : vector<1x1x8x8xf32> to vector<8x8xf32>
    %59 = vector.shape_cast %56 : vector<8x8xf32> to vector<1x1x8x8xf32>
    tpu.vector_store %arg7[%c0_22, %c1, %c0_23, %c0_24], %59 {strides = array<i32>} : memref<1x4x8x8xf32, #tpu.memory_space<vmem>>, vector<1x1x8x8xf32>,
    %60 = arith.truncf %56 : vector<8x8xf32> to vector<8x8xbf16>
    %cst_25 = arith.constant dense<0.000000e+00> : vector<8x8xf32>
    %61 = tpu.matmul %60, %43, %cst_25 {dimension_numbers = #tpu.dot_dimension_numbers<[1], [0], [0], [1], [0, 0, 1, 1], [], []>} : vector<8x8xbf16>, vector<8x8xbf16>, vector<8x8xf32> -> vector<8x8xf32>
    %c0_26 = arith.constant 0 : index
    %c8 = arith.constant 8 : index
    %62 = vector.load %arg8[%c0_26, %c8] : memref<8x32xf32, #tpu.memory_space<vmem>>, vector<8x8xf32>
    tpu.vector_store %arg8[%c0_26, %c8], %61 {strides = array<i32>} : memref<8x32xf32, #tpu.memory_space<vmem>>, vector<8x8xf32>,
    %63 = vector.extract_strided_slice %11 {offsets = [0, 16], sizes = [8, 8], strides = [1, 1]} : vector<8x32xbf16> to vector<8x8xbf16>
    %64 = vector.extract_strided_slice %13 {offsets = [0, 16], sizes = [8, 8], strides = [1, 1]} : vector<8x32xbf16> to vector<8x8xbf16>
    %65 = vector.extract_strided_slice %15 {offsets = [0, 16], sizes = [8, 8], strides = [1, 1]} : vector<8x32xbf16> to vector<8x8xbf16>
    %cst_27 = arith.constant dense<0.000000e+00> : vector<8x8xf32>
    %66 = tpu.matmul %63, %64, %cst_27 {dimension_numbers = #tpu.dot_dimension_numbers<[1], [1], [0], [0], [0, 0, 1, 0], [], []>} : vector<8x8xbf16>, vector<8x8xbf16>, vector<8x8xf32> -> vector<8x8xf32>
    %cst_28 = arith.constant -1.000000e+30 : f32
    %67 = vector.broadcast %cst_28 : f32 to vector<8x8xf32>
    %68 = arith.select %18, %66, %67 : vector<8x8xi1>, vector<8x8xf32>
    %cst_29 = arith.constant dense<0xFF800000> : vector<8xf32>
    %69 = vector.multi_reduction <maximumf>, %68, %cst_29 [1] : vector<8x8xf32> to vector<8xf32>
    %70 = vector.shape_cast %69 : vector<8xf32> to vector<8x1xf32>
    %71 = vector.broadcast %70 : vector<8x1xf32> to vector<8x8xf32>
    %72 = arith.subf %68, %71 : vector<8x8xf32>
    %73 = math.exp %72 : vector<8x8xf32>
    %cst_30 = arith.constant dense<0.000000e+00> : vector<8xf32>
    %74 = vector.multi_reduction <add>, %73, %cst_30 [1] : vector<8x8xf32> to vector<8xf32>
    %75 = vector.shape_cast %74 : vector<8xf32> to vector<8x1xf32>
    %76 = tpu.reciprocal %75 {approx = true} : vector<8x1xf32> -> vector<8x1xf32>
    %77 = vector.broadcast %76 : vector<8x1xf32> to vector<8x8xf32>
    %78 = arith.mulf %73, %77 : vector<8x8xf32>
    %c0_31 = arith.constant 0 : index
    %c2 = arith.constant 2 : index
    %c0_32 = arith.constant 0 : index
    %c0_33 = arith.constant 0 : index
    %79 = vector.load %arg7[%c0_31, %c2, %c0_32, %c0_33] : memref<1x4x8x8xf32, #tpu.memory_space<vmem>>, vector<1x1x8x8xf32>
    %80 = vector.shape_cast %79 : vector<1x1x8x8xf32> to vector<8x8xf32>
    %81 = vector.shape_cast %78 : vector<8x8xf32> to vector<1x1x8x8xf32>
    tpu.vector_store %arg7[%c0_31, %c2, %c0_32, %c0_33], %81 {strides = array<i32>} : memref<1x4x8x8xf32, #tpu.memory_space<vmem>>, vector<1x1x8x8xf32>,
    %82 = arith.truncf %78 : vector<8x8xf32> to vector<8x8xbf16>
    %cst_34 = arith.constant dense<0.000000e+00> : vector<8x8xf32>
    %83 = tpu.matmul %82, %65, %cst_34 {dimension_numbers = #tpu.dot_dimension_numbers<[1], [0], [0], [1], [0, 0, 1, 1], [], []>} : vector<8x8xbf16>, vector<8x8xbf16>, vector<8x8xf32> -> vector<8x8xf32>
    %c0_35 = arith.constant 0 : index
    %c16 = arith.constant 16 : index
    %84 = vector.load %arg8[%c0_35, %c16] : memref<8x32xf32, #tpu.memory_space<vmem>>, vector<8x8xf32>
    tpu.vector_store %arg8[%c0_35, %c16], %83 {strides = array<i32>} : memref<8x32xf32, #tpu.memory_space<vmem>>, vector<8x8xf32>,
    %85 = vector.extract_strided_slice %11 {offsets = [0, 24], sizes = [8, 8], strides = [1, 1]} : vector<8x32xbf16> to vector<8x8xbf16>
    %86 = vector.extract_strided_slice %13 {offsets = [0, 24], sizes = [8, 8], strides = [1, 1]} : vector<8x32xbf16> to vector<8x8xbf16>
    %87 = vector.extract_strided_slice %15 {offsets = [0, 24], sizes = [8, 8], strides = [1, 1]} : vector<8x32xbf16> to vector<8x8xbf16>
    %cst_36 = arith.constant dense<0.000000e+00> : vector<8x8xf32>
    %88 = tpu.matmul %85, %86, %cst_36 {dimension_numbers = #tpu.dot_dimension_numbers<[1], [1], [0], [0], [0, 0, 1, 0], [], []>} : vector<8x8xbf16>, vector<8x8xbf16>, vector<8x8xf32> -> vector<8x8xf32>
    %cst_37 = arith.constant -1.000000e+30 : f32
    %89 = vector.broadcast %cst_37 : f32 to vector<8x8xf32>
    %90 = arith.select %18, %88, %89 : vector<8x8xi1>, vector<8x8xf32>
    %cst_38 = arith.constant dense<0xFF800000> : vector<8xf32>
    %91 = vector.multi_reduction <maximumf>, %90, %cst_38 [1] : vector<8x8xf32> to vector<8xf32>
    %92 = vector.shape_cast %91 : vector<8xf32> to vector<8x1xf32>
    %93 = vector.broadcast %92 : vector<8x1xf32> to vector<8x8xf32>
    %94 = arith.subf %90, %93 : vector<8x8xf32>
    %95 = math.exp %94 : vector<8x8xf32>
    %cst_39 = arith.constant dense<0.000000e+00> : vector<8xf32>
    %96 = vector.multi_reduction <add>, %95, %cst_39 [1] : vector<8x8xf32> to vector<8xf32>
    %97 = vector.shape_cast %96 : vector<8xf32> to vector<8x1xf32>
    %98 = tpu.reciprocal %97 {approx = true} : vector<8x1xf32> -> vector<8x1xf32>
    %99 = vector.broadcast %98 : vector<8x1xf32> to vector<8x8xf32>
    %100 = arith.mulf %95, %99 : vector<8x8xf32>
    %c0_40 = arith.constant 0 : index
    %c3 = arith.constant 3 : index
    %c0_41 = arith.constant 0 : index
    %c0_42 = arith.constant 0 : index
    %101 = vector.load %arg7[%c0_40, %c3, %c0_41, %c0_42] : memref<1x4x8x8xf32, #tpu.memory_space<vmem>>, vector<1x1x8x8xf32>
    %102 = vector.shape_cast %101 : vector<1x1x8x8xf32> to vector<8x8xf32>
    %103 = vector.shape_cast %100 : vector<8x8xf32> to vector<1x1x8x8xf32>
    tpu.vector_store %arg7[%c0_40, %c3, %c0_41, %c0_42], %103 {strides = array<i32>} : memref<1x4x8x8xf32, #tpu.memory_space<vmem>>, vector<1x1x8x8xf32>,
    %104 = arith.truncf %100 : vector<8x8xf32> to vector<8x8xbf16>
    %cst_43 = arith.constant dense<0.000000e+00> : vector<8x8xf32>
    %105 = tpu.matmul %104, %87, %cst_43 {dimension_numbers = #tpu.dot_dimension_numbers<[1], [0], [0], [1], [0, 0, 1, 1], [], []>} : vector<8x8xbf16>, vector<8x8xbf16>, vector<8x8xf32> -> vector<8x8xf32>
    %c0_44 = arith.constant 0 : index
    %c24 = arith.constant 24 : index
    %106 = vector.load %arg8[%c0_44, %c24] : memref<8x32xf32, #tpu.memory_space<vmem>>, vector<8x8xf32>
    tpu.vector_store %arg8[%c0_44, %c24], %105 {strides = array<i32>} : memref<8x32xf32, #tpu.memory_space<vmem>>, vector<8x8xf32>,
    %c0_45 = arith.constant 0 : index
    %c0_46 = arith.constant 0 : index
    %107 = vector.load %arg8[%c0_45, %c0_46] : memref<8x32xf32, #tpu.memory_space<vmem>>, vector<8x32xf32>
    %108 = arith.truncf %107 : vector<8x32xf32> to vector<8x32xbf16>
    %c0_47 = arith.constant 0 : index
    %c0_48 = arith.constant 0 : index
    %109 = vector.load %arg4[%c0_47, %c0_48] : memref<32x32xbf16, #tpu.memory_space<vmem>>, vector<32x32xbf16>
    %cst_49 = arith.constant dense<0.000000e+00> : vector<8x32xf32>
    %110 = tpu.matmul %108, %109, %cst_49 {dimension_numbers = #tpu.dot_dimension_numbers<[1], [0], [0], [1], [0, 0, 1, 1], [], []>} : vector<8x32xbf16>, vector<32x32xbf16>, vector<8x32xf32> -> vector<8x32xf32>
    %c0_50 = arith.constant 0 : index
    %c0_51 = arith.constant 0 : index
    %111 = vector.load %arg5[%c0_50, %c0_51] : memref<1x32xf32, #tpu.memory_space<vmem>>, vector<1x32xf32>
    %112 = vector.broadcast %111 : vector<1x32xf32> to vector<8x32xf32>
    %113 = arith.addf %110, %112 : vector<8x32xf32>
    %114 = vector.shape_cast %113 : vector<8x32xf32> to vector<1x8x32xf32>
    %c0_52 = arith.constant 0 : index
    %c0_53 = arith.constant 0 : index
    %c0_54 = arith.constant 0 : index
    %115 = vector.load %arg6[%c0_52, %c0_53, %c0_54] : memref<1x8x32xf32, #tpu.memory_space<vmem>>, vector<1x8x32xf32>
    tpu.vector_store %arg6[%c0_52, %c0_53, %c0_54], %114 {strides = array<i32>} : memref<1x8x32xf32, #tpu.memory_space<vmem>>, vector<1x8x32xf32>,
    return
  }
  func.func @transform_0(%arg0: i32) -> (i32, i32, i32) {
    %c0_i32 = arith.constant 0 : i32
    %c0_i32_0 = arith.constant 0 : i32
    %c0_i32_1 = arith.constant 0 : i32
    return %arg0, %c0_i32, %c0_i32_0 : i32, i32, i32
  }
  func.func @transform_1(%arg0: i32) -> (i32, i32) {
    %c0_i32 = arith.constant 0 : i32
    %c0_i32_0 = arith.constant 0 : i32
    %c0_i32_1 = arith.constant 0 : i32
    return %c0_i32, %c0_i32_0 : i32, i32
  }
  func.func @transform_2(%arg0: i32) -> (i32, i32) {
    %c0_i32 = arith.constant 0 : i32
    %c0_i32_0 = arith.constant 0 : i32
    %c0_i32_1 = arith.constant 0 : i32
    return %c0_i32, %c0_i32_0 : i32, i32
  }
  func.func @transform_3(%arg0: i32) -> (i32, i32) {
    %c0_i32 = arith.constant 0 : i32
    %c0_i32_0 = arith.constant 0 : i32
    %c0_i32_1 = arith.constant 0 : i32
    return %c0_i32, %c0_i32_0 : i32, i32
  }
  func.func @transform_4(%arg0: i32) -> (i32, i32) {
    %c0_i32 = arith.constant 0 : i32
    %c0_i32_0 = arith.constant 0 : i32
    %c0_i32_1 = arith.constant 0 : i32
    return %c0_i32, %c0_i32_0 : i32, i32
  }
  func.func @transform_5(%arg0: i32) -> (i32, i32, i32) {
    %c0_i32 = arith.constant 0 : i32
    %c0_i32_0 = arith.constant 0 : i32
    %c0_i32_1 = arith.constant 0 : i32
    return %arg0, %c0_i32, %c0_i32_0 : i32, i32, i32
  }
  func.func @transform_6(%arg0: i32) -> (i32, i32, i32, i32) {
    %c0_i32 = arith.constant 0 : i32
    %c0_i32_0 = arith.constant 0 : i32
    %c0_i32_1 = arith.constant 0 : i32
    %c0_i32_2 = arith.constant 0 : i32
    return %arg0, %c0_i32, %c0_i32_0, %c0_i32_1 : i32, i32, i32, i32
  }
}

</mosaic_0001>

<bundles_post_ra>
// kernel: attention_forward.1
= control target key start
LH: loop header
LB: loop body
LE: loop exit
PB: predicated region body
PF: predicated region fallthrough
CT: control target
= control target key end

     0   :  { %12 = vsyncpa [#allocation4], 0  ;;  %s1596_s0 = inlined_call_operand.vmem [shape: f32[2,8,32], index: 0, kind: input, shape index: {}]   ;;  %s1597_s1 = inlined_call_operand.vmem [shape: bf16[32,96], index: 1, kind: input, shape index: {}]   ;;  %s1598_s2 = inlined_call_operand.vmem [shape: f32[1,96], index: 2, kind: input, shape index: {}]   ;;  %s1599_s3 = inlined_call_operand.vmem [shape: bf16[32,32], index: 3, kind: input, shape index: {}]   ;;  %s1600_s4 = inlined_call_operand.vmem [shape: f32[1,32], index: 4, kind: input, shape index: {}]   ;;  %s1601_s5 = inlined_call_operand.hbm [shape: f32[2,8,32], index: 5, kind: output, shape index: {0}]   ;;  %s1602_s6 = inlined_call_operand.hbm [shape: f32[2,4,8,8], index: 6, kind: output, shape index: {1}]  }
   0x1   :  { %14 = vsyncpa [#allocation4 + $0x1], 0 }
   0x2   :  { %15 = vsyncpa [#allocation6], 0 }
   0x3   :  { %17 = vsyncpa [#allocation6 + $0x1], 0  ;;  %s1354_s21 = smov 0   ;;  %s1356_s22 = smov 0  }
   0x4   :  { %s1358_s23 = smov 0   ;;  %s1360_s24 = smov 0  }
   0x5 LB: > { %s1375_s25 = sadd.s32 4294967295, %s1298_s24   ;;  %s1003_s26 = sadd.s32 4294967294, %s1298_s24   ;;  %s1298_s24 = sphi %s1360_s24, %s1608_s24   ;;  %s1294_s23 = sphi %s1358_s23, %s1607_s23   ;;  %s1290_s22 = sphi %s1356_s22, %s1606_s22   ;;  %s1286_s21 = sphi %s1354_s21, %s1605_s21  }
   0x6   : > { %s1379_s27 = sadd.s32 1, %s1298_s24   ;;  %s140_s28 = sadd.s32 1, %s1294_s23 }
   0x7   : > { %s137_s29 = ssub.s32 %s1298_s24, %s1379_s27  ;;  %p150_p0 = scmp.ne.s32.totalorder %s1294_s23, %s1290_s22 }
   0x8   : > { %p138_p1 = scmp.eq.s32.totalorder %s137_s29, 0  ;;  %p151_p2 = scmp.eq.s32.totalorder %s1375_s25, 1 }
   0x9   : > { %p156_p3 = scmp.ne.s32.totalorder %s1290_s22, %s1286_s21  ;;  %p157_p4 = scmp.eq.s32.totalorder %s1003_s26, 1 }
   0xa   : > { %s1390_s30 = scalar_select %p138_p1, %s1294_s23, %s140_s28  }
   0xb   : > { %p1392_p5 = por %p151_p2, %p150_p0  ;;  %p1396_p6 = por %p157_p4, %p156_p3 }
   0xc   : > { %p1006_p7 = scmp.ge.s32.totalorder %s1298_s24, 1  ;;  %p220_p8 = scmp.lt.s32.totalorder %s1298_s24, 3 }
   0xe   : > { %p221_p9 = pnand %p1006_p7, %p220_p8 }
   0xf   : > { %v1184_v0 = vld [vmem:[%s1597_s1] sm:$0xff] (!%p221_p9)   ;;  %v1300_v1 = vmov (!%p221_p9), 0.0   ;;  %v1185_v2 = vld [vmem:[%s1597_s1 + $0x8] sm:$0xff] (!%p221_p9)   ;;  %vm1301_vm0 = vmmov (!%p221_p9), 0   ;;  %p254_p10 = scmp.lt.s32.totalorder (!%p221_p9), %s1375_s25, 1  ;;  %vm284_vm1 = vcmask (!%p221_p9), 261120   ;;  %v331_v25 = vlaneseq (!%p221_p9) }
  0x10   : > { %224 = sbr.rel (%p221_p9) target bundleno = 1525 (0x5f5), region = 40  ;;  %1059 = vmatprep.subr.bf16.mxu0 (!%p221_p9), %v1300_v1  ;;  %1067 = vmatprep.subr.bf16.mxu1 (!%p221_p9), %v1300_v1  ;;  %v1010_v5 = vld [vmem:[%s1598_s2] ss:$0 sm:$0xff] (!%p221_p9)  ;;  %s1302_s20 = smov (!%p221_p9), 96   ;;  %vm339_vm2 = vcmask (!%p221_p9), 64512   ;;  %vm405_vm4 = vcmask (!%p221_p9), 1043456  }
  0x11   : > { %1060 = vmatpush3.bf16.msra.mxu0 (!%p221_p9), %v1184_v0  ;;  %1063 = vmatprep.mubr.msk.bf16.mxu0 (!%p221_p9), %vm1301_vm0, %v1300_v1  ;;  %s1303_s26 = smov (!%p221_p9), 120   ;;  %s1304_s28 = smov (!%p221_p9), 88   ;;  %v332_v26 = vshrl.u32 (!%p221_p9), %v331_v25, 7  ;;  %v334_v27 = vand.u32 (!%p221_p9), 127, %v331_v25  ;;  %vm568_vm5 = vcmask (!%p221_p9), 130112   ;;  %vm687_vm6 = vcmask (!%p221_p9), 195712  }
  0x12   : > { %1061 = vmatprep.subr.bf16.mxu0 (!%p221_p9), %v1300_v1  ;;  %1069 = vmatprep.mubr.msk.bf16.mxu1 (!%p221_p9), %vm1301_vm0, %v1300_v1  ;;  %s1305_s29 = smov (!%p221_p9), 80   ;;  %s1306_s9 = smov (!%p221_p9), 112   ;;  %vm806_vm7 = vcmask (!%p221_p9), 261312  }
  0x13   : > { %s1307_s10 = smov (!%p221_p9), 72   ;;  %s1308_s11 = smov (!%p221_p9), 104   ;;  %vm335_vm3 = vcmp.le.s32.totalorder (!%p221_p9), %v334_v27, %v332_v26 }
  0x14   : > { %s1309_s12 = smov (!%p221_p9), 56   ;;  %s1312_s15 = smov (!%p221_p9), 48  }
  0x15   : > { %1062 = vmatpush3.bf16.msra.mxu0 (!%p221_p9), %v1185_v2  ;;  %s1470_s16 = sand.u32 (!%p221_p9), 1, %s1290_s22   ;;  %s1313_s19 = smov (!%p221_p9), 8  }
  0x16   : > { %1073 = vmatprep.subr.bf16.mxu0 (!%p221_p9), %v1300_v1 }
  0x17   : > { %s255_s13 = scalar_select %p254_p10, %s1375_s25, 1 }
  0x19   : > { %s1009_s14 = sshll.u32 %s255_s13, 3  ;;  %s1310_s13 = smov 64  }
  0x1a   : > { %s257_s17 = scalar_lea.vmem %s1596_s0, %s1009_s14  ;;  %s1311_s14 = smov 40  }
  0x1b   : > { %v259_v3 = vld [vmem:[%s257_s17] sm:$0xff]  ;;  %s1008_s17 = sshll.u32 %s1470_s16, 5 }
  0x1c   : > { %v260_v4 = vpack.c.bf16 %v259_v3, %v259_v3  ;;  %s1473_s18 = scalar_lea.vmem [#allocation5], %s1008_s17  ;;  %s883_s17 = scalar_lea.sflag [#allocation6], %s1470_s16 }
  0x1e   : > { %1064 = vmatmul.mubr.msk.bf16.vlgmr.msra.gmra.mrb[0].mxu0 %vm284_vm1, %v260_v4 }
  0x1f   : > { %1075 = vmatprep.mubr.msk.bf16.mxu0 %vm1301_vm0, %v1300_v1 }
  0xf1   : > { %v322_v6 = vpop.f32.mrb[0].mxu0 }
  0xf2   : > { %v323_v7 = vadd.f32 %v1010_v5, %v322_v6  ;;  %v1065_v8 = vpop.f32.mrb[1].mxu0 }
  0xf3   : > { %v325_v9 = vpop.f32.mrb[2].mxu0 }
  0xf4   : > { %v328_v10 = vmul.f32 0.35355338, %v323_v7  ;;  %v1427_v11 = vpack.c.bf16 %v323_v7, %v323_v7  ;;  %v1066_v12 = vpop.f32.mrb[3].mxu0 }
  0xf6   : > { %v329_v13 = vpack.c.bf16 %v328_v10, %v328_v10  ;;  %337 = vrot.lane.b32.xlu0 %v1427_v11, %s1302_s20 }
  0xf8   : > { %451 = vrot.lane.b32.xlu1 %v329_v13, %s1303_s26  ;;  %s1316_s26 = smov [#allocation5]  }
  0xfa   : > { %453 = vrot.lane.b32.xlu0 %v1427_v11, %s1304_s28  ;;  %s1208_s28 = sshll.u32 %s1316_s26, 4  ;;  %s1209_s28 = int_to_ptr.vmem [resolvable:$false] %s1208_s28 }
  0xfc   : > { %572 = vrot.lane.b32.xlu1 %v1427_v11, %s1305_s29 }
  0xfe   : > { %570 = vrot.lane.b32.xlu0 %v329_v13, %s1306_s9  ;;  %s1314_s9 = smov 16  }
 0x100   : > { %691 = vrot.lane.b32.xlu1 %v1427_v11, %s1307_s10  ;;  %s1315_s10 = smov 24  }
 0x102   : > { %689 = vrot.lane.b32.xlu0 %v329_v13, %s1308_s11  ;;  %s909_s11 = sshll.u32 %s1473_s18, 4  ;;  %s1512_s11 = int_to_ptr.vmem [resolvable:$true] %s909_s11 }
 0x103   : > { %s1204_s20 = scalar_lea.vmem %s1512_s11, 512  ;;  %p1211_p0 = scmp.lt.s32.totalorder %s1512_s11, %s1209_s28 }
 0x104   : > { %p1205_p11 = scmp.ne.s32.totalorder %s1512_s11, %s1204_s20 }
 0x106   : > { %p1206_p12 = pnand %p1205_p11, %p1392_p5 }
 0x108   : > { %p1207_p13 = pneg %p1206_p12 }
 0x168   : > { %v338_v14 = vpop.permute.xlu0 %337 }
 0x169   : > { %v344_v15 = vsel %vm339_vm2, %v338_v14, 0 }
 0x16a   : > { %1068 = vmatpush3.bf16.xpose.msra.mxu1 %v344_v15  ;;  %v452_v17 = vpop.permute.xlu1 %451 }
 0x16b   : > { %1079 = vmatprep.subr.bf16.mxu1 %v1300_v1 }
 0x16c   : > { %v454_v16 = vpop.permute.xlu0 %453 }
 0x16d   : > { %v459_v18 = vsel %vm339_vm2, %v454_v16, 0 }
 0x16e   : > { %v573_v19 = vpop.permute.xlu1 %572 }
 0x16f   : > { %v578_v20 = vsel %vm339_vm2, %v573_v19, 0 }
 0x170   : > { %v571_v22 = vpop.permute.xlu0 %570 }
 0x171   : > { %1070 = vmatmul.mubr.msk.bf16.vlgmr.msra.gmra.mrb[0].mxu1 %vm339_vm2, %v329_v13 }
 0x172   : > { %1080 = vmatpush3.bf16.xpose.msra.mxu1 %v459_v18  ;;  %1081 = vmatprep.mubr.msk.bf16.mxu1 %vm1301_vm0, %v1300_v1  ;;  %v692_v21 = vpop.permute.xlu1 %691 }
 0x173   : > { %1091 = vmatprep.subr.bf16.mxu1 %v1300_v1  ;;  %v697_v23 = vsel %vm339_vm2, %v692_v21, 0 }
 0x174   : > { %v690_v24 = vpop.permute.xlu0 %689 }
 0x179   : > { %1082 = vmatmul.mubr.msk.bf16.vlgmr.msra.gmra.mrb[4].mxu1 %vm339_vm2, %v452_v17 }
 0x17a   : > { %1092 = vmatpush3.bf16.xpose.msra.mxu1 %v578_v20  ;;  %1093 = vmatprep.mubr.msk.bf16.mxu1 %vm1301_vm0, %v1300_v1 }
 0x17b   : > { %1103 = vmatprep.subr.bf16.mxu1 %v1300_v1 }
 0x181   : > { %1094 = vmatmul.mubr.msk.bf16.vlgmr.msra.gmra.mrb[8].mxu1 %vm339_vm2, %v571_v22 }
 0x182   : > { %1104 = vmatpush3.bf16.xpose.msra.mxu1 %v697_v23  ;;  %1105 = vmatprep.mubr.msk.bf16.mxu1 %vm1301_vm0, %v1300_v1 }
 0x183   : > { %1115 = vmatprep.subr.bf16.mxu1 %v1300_v1 }
 0x189   : > { %1106 = vmatmul.mubr.msk.bf16.vlgmr.msra.gmra.mrb[12].mxu1 %vm339_vm2, %v690_v24 }
 0x18a   : > { %1119 = vmatprep.mubr.msk.bf16.mxu1 %vm1301_vm0, %v1300_v1 }
 0x244   : > { %v380_v28 = vpop.f32.mrb[0].mxu1 }
 0x245   : > { %v386_v29 = vsel %vm335_vm3, %v380_v28, -1e+30  ;;  %v1071_v30 = vpop.f32.mrb[1].mxu1 }
 0x246   : > { %v383_v31 = vpop.f32.mrb[2].mxu1  ;;  %v387_v32 = vsel %vm339_vm2, %v386_v29, -inf }
 0x247   : > { %388 = vmax.xlane.f32.xlu1 %v387_v32  ;;  %v1072_v33 = vpop.f32.mrb[3].mxu1 }
 0x24c   : > { %v495_v34 = vpop.f32.mrb[4].mxu1 }
 0x24d   : > { %v501_v35 = vsel %vm335_vm3, %v495_v34, -1e+30  ;;  %v1083_v36 = vpop.f32.mrb[5].mxu1 }
 0x24e   : > { %v498_v37 = vpop.f32.mrb[6].mxu1  ;;  %v502_v38 = vsel %vm339_vm2, %v501_v35, -inf }
 0x24f   : > { %503 = vmax.xlane.f32.xlu0 %v502_v38  ;;  %v1084_v39 = vpop.f32.mrb[7].mxu1 }
 0x254   : > { %v614_v40 = vpop.f32.mrb[8].mxu1 }
 0x255   : > { %v620_v41 = vsel %vm335_vm3, %v614_v40, -1e+30  ;;  %v1095_v42 = vpop.f32.mrb[9].mxu1 }
 0x256   : > { %v617_v43 = vpop.f32.mrb[10].mxu1  ;;  %v621_v44 = vsel %vm339_vm2, %v620_v41, -inf  ;;  %v1187_v42 = vld [vmem:[%s1599_s3 + $0x8] sm:$0xff]  }
 0x257   : > { %622 = vmax.xlane.f32.xlu0 %v621_v44  ;;  %v1096_v45 = vpop.f32.mrb[11].mxu1 }
 0x25c   : > { %v733_v46 = vpop.f32.mrb[12].mxu1 }
 0x25d   : > { %v739_v47 = vsel %vm335_vm3, %v733_v46, -1e+30  ;;  %v1107_v48 = vpop.f32.mrb[13].mxu1 }
 0x25e   : > { %v736_v49 = vpop.f32.mrb[14].mxu1  ;;  %v740_v50 = vsel %vm339_vm2, %v739_v47, -inf }
 0x25f   : > { %741 = vmax.xlane.f32.xlu1 %v740_v50  ;;  %v1108_v51 = vpop.f32.mrb[15].mxu1 }
 0x2d4   : > { %v389_v52 = vpop.xlane.xlu1 %388 }
 0x2d5   : > { %v390_v53 = vsub.f32 %v386_v29, %v389_v52 }
 0x2d7   : > { %v391_v54 = vmul.f32 1.442695, %v390_v53 }
 0x2d9   : > { %1188 = vpow2.f32 %v391_v54 }
 0x2dc   : > { %v504_v55 = vpop.xlane.xlu0 %503 }
 0x2dd   : > { %v505_v56 = vsub.f32 %v501_v35, %v504_v55 }
 0x2df   : > { %v506_v57 = vmul.f32 1.442695, %v505_v56 }
 0x2e1   : > { %1190 = vpow2.f32 %v506_v57 }
 0x2e3   : > { %v1189_v58 = vpop.eup %1188 }
 0x2e4   : > { %v623_v59 = vpop.xlane.xlu0 %622  ;;  %v393_v60 = vsel %vm339_vm2, %v1189_v58, 0.0 }
 0x2e5   : > { %v624_v61 = vsub.f32 %v620_v41, %v623_v59  ;;  %394 = vadd.xlane.f32.xlu0 %v393_v60  ;;  %v1186_v41 = vld [vmem:[%s1599_s3] sm:$0xff]  }
 0x2e6   : > { %1116 = vmatpush3.bf16.msra.mxu1 %v1186_v41 }
 0x2e7   : > { %v625_v62 = vmul.f32 1.442695, %v624_v61  ;;  %1117 = vmatprep.subr.bf16.mxu1 %v1300_v1 }
 0x2e9   : > { %1192 = vpow2.f32 %v625_v62 }
 0x2ea   : > { %1118 = vmatpush3.bf16.msra.mxu1 %v1187_v42 }
 0x2eb   : > { %v1191_v63 = vpop.eup %1190 }
 0x2ec   : > { %v508_v0 = vsel %vm339_vm2, %v1191_v63, 0.0  ;;  %v742_v4 = vpop.xlane.xlu1 %741 }
 0x2ed   : > { %509 = vadd.xlane.f32.xlu1 %v508_v0  ;;  %v743_v5 = vsub.f32 %v739_v47, %v742_v4 }
 0x2ef   : > { %v744_v6 = vmul.f32 1.442695, %v743_v5 }
 0x2f1   : > { %1194 = vpow2.f32 %v744_v6 }
 0x2f3   : > { %v1193_v2 = vpop.eup %1192 }
 0x2f4   : > { %v627_v3 = vsel %vm339_vm2, %v1193_v2, 0.0 }
 0x2f5   : > { %628 = vadd.xlane.f32.xlu0 %v627_v3 }
 0x2fb   : > { %v1195_v7 = vpop.eup %1194 }
 0x2fc   : > { %v746_v8 = vsel %vm339_vm2, %v1195_v7, 0.0 }
 0x2fe   : > { %516 = vrot.lane.b32.xlu1 %v1427_v11, %s1309_s12  ;;  %s1036_s12 = sshll.u32 %s1375_s25, 9 }
 0x30b   : > { %400 = vrot.lane.b32.xlu0 %v1427_v11, %s1310_s13 }
 0x30f   : > { %754 = vrot.lane.b32.xlu0 %v1427_v11, %s1311_s14 }
 0x322   : > { %747 = vadd.xlane.f32.xlu1 %v746_v8 }
 0x333   : > { %635 = vrot.lane.b32.xlu1 %v1427_v11, %s1312_s15  ;;  %s1517_s15 = scalar_lea.hbm %s1602_s6, %s1036_s12 }
 0x372   : > { %v395_v9 = vpop.xlane.xlu0 %394 }
 0x373   : > { %1196 = vrcp.f32 %v395_v9 }
 0x37a   : > { %v510_v10 = vpop.xlane.xlu1 %509 }
 0x37b   : > { %1198 = vrcp.f32 %v510_v10 }
 0x37d   : > { %v1197_v12 = vpop.eup %1196 }
 0x37e   : > { %v397_v13 = vmul.f32 %v1197_v12, %v1189_v58  ;;  %v517_v18 = vpop.permute.xlu1 %516 }
 0x37f   : > { %v522_v20 = vsel %vm405_vm4, %v517_v18, 0 }
 0x380   : > { %398 = vst.msk [vmem:[%s1473_s18] sm:$0xff] %vm339_vm2, %v397_v13  ;;  %v399_v19 = vpack.c.bf16 %v397_v13, %v397_v13 }
 0x382   : > { %v629_v14 = vpop.xlane.xlu0 %628 }
 0x383   : > { %1200 = vrcp.f32 %v629_v14 }
 0x385   : > { %v1199_v15 = vpop.eup %1198 }
 0x386   : > { %v512_v11 = vmul.f32 %v1199_v15, %v1191_v63  ;;  %v401_v16 = vpop.permute.xlu0 %400 }
 0x387   : > { %v407_v17 = vsel %vm405_vm4, %v401_v16, 0 }
 0x388   : > { %1074 = vmatpush3.bf16.msra.mxu0 %v407_v17  ;;  %1017 = vst.msk [vmem:[%s1473_s18 + $0x8] sm:$0xff] %vm339_vm2, %v512_v11  ;;  %v515_v23 = vpack.c.bf16 %v512_v11, %v512_v11 }
 0x389   : > { %1085 = vmatprep.subr.bf16.mxu0 %v1300_v1 }
 0x38a   : > { %v755_v27 = vpop.permute.xlu0 %754 }
 0x38b   : > { %1076 = vmatmul.mubr.msk.bf16.vlgmr.msra.gmra.mrb[4].mxu0 %vm339_vm2, %v399_v19  ;;  %v760_v29 = vsel %vm405_vm4, %v755_v27, 0 }
 0x38c   : > { %1086 = vmatpush3.bf16.msra.mxu0 %v522_v20  ;;  %1087 = vmatprep.mubr.msk.bf16.mxu0 %vm1301_vm0, %v1300_v1 }
 0x38d   : > { %v1201_v21 = vpop.eup %1200  ;;  %1097 = vmatprep.subr.bf16.mxu0 %v1300_v1 }
 0x38e   : > { %v631_v22 = vmul.f32 %v1201_v21, %v1193_v2 }
 0x390   : > { %1020 = vst.msk [vmem:[%s1473_s18 + $0x10] sm:$0xff] %vm339_vm2, %v631_v22  ;;  %v634_v28 = vpack.c.bf16 %v631_v22, %v631_v22 }
 0x393   : > { %1088 = vmatmul.mubr.msk.bf16.vlgmr.msra.gmra.mrb[8].mxu0 %vm339_vm2, %v515_v23 }
 0x394   : > { %1099 = vmatprep.mubr.msk.bf16.mxu0 %vm1301_vm0, %v1300_v1 }
 0x3af   : > { %v748_v24 = vpop.xlane.xlu1 %747 }
 0x3b0   : > { %1202 = vrcp.f32 %v748_v24 }
 0x3b3   : > { %v636_v25 = vpop.permute.xlu1 %635 }
 0x3b4   : > { %v641_v26 = vsel %vm405_vm4, %v636_v25, 0 }
 0x3b5   : > { %1098 = vmatpush3.bf16.msra.mxu0 %v641_v26 }
 0x3b6   : > { %1109 = vmatprep.subr.bf16.mxu0 %v1300_v1 }
 0x3b8   : > { %1100 = vmatmul.mubr.msk.bf16.vlgmr.msra.gmra.mrb[12].mxu0 %vm339_vm2, %v634_v28 }
 0x3b9   : > { %1110 = vmatpush3.bf16.msra.mxu0 %v760_v29  ;;  %1111 = vmatprep.mubr.msk.bf16.mxu0 %vm1301_vm0, %v1300_v1 }
 0x3ba   : > { %v1203_v30 = vpop.eup %1202 }
 0x3bb   : > { %v750_v31 = vmul.f32 %v1203_v30, %v1195_v7 }
 0x3bd   : > { %v753_v32 = vpack.c.bf16 %v750_v31, %v750_v31  ;;  %1023 = vst.msk [vmem:[%s1473_s18 + $0x18] sm:$0xff] %vm339_vm2, %v750_v31  ;;  %s1210_s18 = scalar_lea.vmem %s1209_s28, 1024 }
 0x3be   : > { %p1212_p1 = scmp.lt.s32.totalorder %s1210_s18, %s1204_s20 }
 0x3c0   : > { %1112 = vmatmul.mubr.msk.bf16.vlgmr.msra.gmra.mrb[16].mxu0 %vm339_vm2, %v753_v32  ;;  %p1213_p2 = por %p1212_p1, %p1211_p0 }
 0x3c2   : > { %p1214_p3 = pnand %p1213_p2, %p1207_p13 }
 0x45e   : > { %v443_v33 = vpop.f32.mrb[4].mxu0 }
 0x45f   : > { %449 = vst.msk [vmem:[#allocation2] sm:$0xff] %vm339_vm2, %v443_v33  ;;  %v1077_v34 = vpop.f32.mrb[5].mxu0 }
 0x460   : > { %v446_v35 = vpop.f32.mrb[6].mxu0 }
 0x461   : > { %v1078_v36 = vpop.f32.mrb[7].mxu0 }
 0x466   : > { %v558_v37 = vpop.f32.mrb[8].mxu0 }
 0x467   : > { %565 = vrot.lane.b32.xlu1 %v558_v37, %s1313_s19  ;;  %v1089_v38 = vpop.f32.mrb[9].mxu0 }
 0x468   : > { %v561_v39 = vpop.f32.mrb[10].mxu0 }
 0x469   : > { %v1090_v40 = vpop.f32.mrb[11].mxu0 }
 0x48b   : > { %v677_v43 = vpop.f32.mrb[12].mxu0 }
 0x48c   : > { %684 = vrot.lane.b32.xlu0 %v677_v43, %s1314_s9  ;;  %v1101_v44 = vpop.f32.mrb[13].mxu0 }
 0x48d   : > { %v680_v45 = vpop.f32.mrb[14].mxu0 }
 0x48e   : > { %v1102_v46 = vpop.f32.mrb[15].mxu0 }
 0x493   : > { %v796_v47 = vpop.f32.mrb[16].mxu0 }
 0x494   : > { %803 = vrot.lane.b32.xlu1 %v796_v47, %s1315_s10  ;;  %v1113_v48 = vpop.f32.mrb[17].mxu0 }
 0x495   : > { %v799_v49 = vpop.f32.mrb[18].mxu0 }
 0x496   : > { %v1114_v50 = vpop.f32.mrb[19].mxu0 }
 0x4d9   : > { %v566_v51 = vpop.permute.xlu1 %565 }
 0x4da   : > { %569 = vst.msk [vmem:[#allocation2] sm:$0xff] %vm568_vm5, %v566_v51 }
 0x4fe   : > { %v685_v1 = vpop.permute.xlu0 %684 }
 0x4ff   : > { %688 = vst.msk [vmem:[#allocation2] sm:$0xff] %vm687_vm6, %v685_v1 }
 0x506   : > { %v804_v52 = vpop.permute.xlu1 %803 }
 0x507   : > { %807 = vst.msk [vmem:[#allocation2] sm:$0xff] %vm806_vm7, %v804_v52 }
 0x50e   : > { %v808_v53 = vld [vmem:[#allocation2] sm:$0xff] }
 0x50f   : > { %v809_v54 = vpack.c.bf16 %v808_v53, %v808_v53 }
 0x511   : > { %1120 = vmatmul.mubr.msk.bf16.vlgmr.msra.gmra.mrb[16].mxu1 %vm284_vm1, %v809_v54 }
 0x512   : > { %1217 = shalt.err (!%p1214_p3)
}
 0x513   : > { %s1218_s29 = scalar_lea.hbm %s1517_s15, 512  ;;  %s1222_s12 = scalar_lea.hbm %s1602_s6, 1024 }
 0x514   : > { %p1219_p4 = scmp.ne.s32.totalorder %s1517_s15, %s1218_s29  ;;  %p1223_p9 = scmp.lt.u32.totalorder %s1517_s15, %s1602_s6 }
 0x515   : > { %p1224_p10 = scmp.lt.u32.totalorder %s1222_s12, %s1218_s29  ;;  %p1226_p12 = scmp.lt.u32.totalorder %s1218_s29, %s1517_s15 }
 0x516   : > { %p1220_p7 = pnand %p1219_p4, %p1392_p5 }
 0x517   : > { %p1225_p11 = por %p1224_p10, %p1223_p9 }
 0x518   : > { %p1221_p8 = pneg %p1220_p7 }
 0x519   : > { %p1227_p13 = por %p1226_p12, %p1225_p11 }
 0x51b   : > { %p1228_p0 = pnand %p1227_p13, %p1221_p8 }
 0x51d   : > { %1231 = shalt.err (!%p1228_p0)
}
 0x51e   : > { %s1317_s20 = smov 128   ;;  %s1007_s26 = sshll.u32 %s1470_s16, 3  ;;  %v1025_v55 = vld [vmem:[%s1600_s4] ss:$0 sm:$0xff] }
 0x51f   : > { %1124 = dma.vmem_to_hbm [thread:$0]  (%p1392_p5), %s1512_s11, 512, %s1517_s15, %s883_s17, %s1317_s20, %s1317_s20, %s1313_s19  }
 0x520   : > { %s1031_s29 = sshll.u32 %s1375_s25, 7  ;;  %s246_s9 = scalar_lea.vmem [#allocation3], %s1007_s26 }
 0x521   : > { %s896_s10 = sshll.u32 %s246_s9, 4  ;;  %s1552_s14 = scalar_lea.hbm %s1601_s5, %s1031_s29  ;;  %s1554_s10 = int_to_ptr.vmem [resolvable:$true] %s896_s10 }
 0x522   : > { %s878_s25 = scalar_lea.sflag [#allocation4], %s1470_s16  ;;  %s1232_s19 = scalar_lea.vmem %s1554_s10, 128 }
 0x523   : > { %p1233_p1 = scmp.ne.s32.totalorder %s1554_s10, %s1232_s19  ;;  %s1318_s11 = smov [#allocation3]  }
 0x524   : > { %s1236_s15 = sshll.u32 %s1318_s11, 4  ;;  %s1237_s15 = int_to_ptr.vmem [resolvable:$false] %s1236_s15 }
 0x525   : > { %p1234_p2 = pnand %p1233_p1, %p1392_p5  ;;  %s1238_s17 = scalar_lea.vmem %s1237_s15, 256 }
 0x526   : > { %p1239_p4 = scmp.lt.s32.totalorder %s1554_s10, %s1237_s15  ;;  %p1240_p7 = scmp.lt.s32.totalorder %s1238_s17, %s1232_s19 }
 0x527   : > { %p1235_p3 = pneg %p1234_p2 }
 0x528   : > { %p1241_p8 = por %p1240_p7, %p1239_p4 }
 0x52a   : > { %p1242_p9 = pnand %p1241_p8, %p1235_p3 }
 0x5e4   : > { %v870_v56 = vpop.f32.mrb[16].mxu1 }
 0x5e5   : > { %v871_v57 = vadd.f32 %v1025_v55, %v870_v56  ;;  %v1121_v58 = vpop.f32.mrb[17].mxu1 }
 0x5e6   : > { %v873_v59 = vpop.f32.mrb[18].mxu1 }
 0x5e7   : > { %v1122_v60 = vpop.f32.mrb[19].mxu1  ;;  %876 = vst.msk [vmem:[%s246_s9] sm:$0xff] %vm284_vm1, %v871_v57 }
 0x5e8   : > { %1245 = shalt.err (!%p1242_p9)
}
 0x5e9   : > { %s1246_s16 = scalar_lea.hbm %s1552_s14, 128  ;;  %s1250_s28 = scalar_lea.hbm %s1601_s5, 256 }
 0x5ea   : > { %p1247_p10 = scmp.ne.s32.totalorder %s1552_s14, %s1246_s16  ;;  %p1251_p13 = scmp.lt.u32.totalorder %s1552_s14, %s1601_s5 }
 0x5eb   : > { %p1252_p0 = scmp.lt.u32.totalorder %s1250_s28, %s1246_s16  ;;  %p1254_p2 = scmp.lt.u32.totalorder %s1246_s16, %s1552_s14 }
 0x5ec   : > { %p1248_p11 = pnand %p1247_p10, %p1392_p5 }
 0x5ed   : > { %p1253_p1 = por %p1252_p0, %p1251_p13 }
 0x5ee   : > { %p1249_p12 = pneg %p1248_p11 }
 0x5ef   : > { %p1255_p3 = por %p1254_p2, %p1253_p1 }
 0x5f1   : > { %p1256_p4 = pnand %p1255_p3, %p1249_p12 }
 0x5f3   : > { %1259 = shalt.err (!%p1256_p4)
}
 0x5f4   : > { %1123 = dma.vmem_to_hbm [thread:$0]  (%p1392_p5), %s1554_s10, 128, %s1552_s14, %s878_s25  }
 0x5f5 PF: > { %p1134_p7 = scmp.ge.s32.totalorder %s1298_s24, 2  ;;  %s924_s9 = sand.u32 1, %s1286_s21  }
 0x5f6   : > { %s925_s12 = scalar_lea.sflag [#allocation4], %s924_s9 }
 0x5f7   : > { %p1128_p8 = pnand %p1134_p7, %p1396_p6 }
 0x5f9   : > { %1277 = dma.done.wait (!%p1128_p8), %s925_s12, 128  }
 0x5fa   : > { %1279 = vsyncadd (!%p1128_p8), %s925_s12, 4294967168  ;;  %s934_s13 = scalar_lea.sflag [#allocation6], %s924_s9 }
 0x5fb   : > { %1281 = dma.done.wait (!%p1128_p8), %s934_s13, 512  }
 0x5fc   : > { %1283 = vsyncadd (!%p1128_p8), %s934_s13, 4294966784  ;;  %p20_p5 = scmp.ge.s32.totalorder %s1379_s27, 4   ;;  %s1605_s21 = smov %s1290_s22 }
 0x5fd   : > { %s1606_s22 = smov %s1294_s23  ;;  %s1607_s23 = smov %s1390_s30 }
 0x5fe   : > { %s1608_s24 = smov %s1379_s27  ;;  %22 = sbr.rel (!%p20_p5) target bundleno = 5 (0x5), region = 95 }
 0x605   :  { %939 = vsyncpa [#allocation4], 1 }
 0x606   :  { %941 = vsyncpa [#allocation4 + $0x1], 1 }
 0x607   :  { %942 = vsyncpa [#allocation6], 1 }
 0x608   :  { %944 = vsyncpa [#allocation6 + $0x1], 1 }

</bundles_post_ra>
